<compile_context>
chip_gen: v7x
topology: tpu7x:2x2x1
jax: 0.10.0
libtpu: 0.0.40
codegen_flags: <defaults>
</compile_context>

<pallas_src>
import functools
import numpy as np
import jax
import jax.numpy as jnp
from jax.experimental import pallas as pl
from jax.experimental.pallas import tpu as pltpu


def _round_up(x, m):
    return ((x + m - 1) // m) * m


def _cdiv(a, b):
    return (a + b - 1) // b


def _pow2_bucket(n, minimum):
    n = max(int(n), 1)
    return max(minimum, 1 << (n - 1).bit_length())


# ----------------------------------------------------------------------------
# Kernel 1: Harris corner response  (dst_harris_computation)
# ----------------------------------------------------------------------------
def _harris_kernel(tile_h, w_in, w_out, main_ref, halo_ref, out_ref):
    T = tile_h

    def shift(x, k):
        # result[:, c] = x[:, (c + k) % w_in]; exact (no wrap) for c <= w_in-1-k,
        # which covers every valid output column (valid cols < W <= w_in - 4).
        return pltpu.roll(x, w_in - k, axis=1)

    # Stitch the 4 halo rows below this tile onto the main block: padded rows
    # [i*T, i*T + T + 4).  One VMEM copy (same cost as v2's row-window slice).
    g = jnp.concatenate([main_ref[...], halo_ref[0:4, :]], axis=0)    # (T+4, w_in)

    scale = 0.125    # cv2.cornerHarris(blockSize=2, ksize=3) scaling, as in v2

    # Separable Sobel.  Horizontal shifts run on the XLU (roll) and co-issue with
    # the VPU adds instead of materializing lane-crossing shifted copies.
    sv = g[0:T + 2, :] + 2.0 * g[1:T + 3, :] + g[2:T + 4, :]          # (T+2, w_in)
    ix = (shift(sv, 2) - sv) * scale                                  # d/dx
    sh = g + 2.0 * shift(g, 1) + shift(g, 2)                          # (T+4, w_in)
    iy = (sh[2:T + 4, :] - sh[0:T + 2, :]) * scale                    # d/dy

    def box2(a):
        # 2x2 un-normalized box sum, same anchoring as v2:
        #   out[r, c] = a[r+1, c+1] + a[r+1, c+2] + a[r+2, c+1] + a[r+2, c+2]
        h = shift(a, 1) + shift(a, 2)
        return h[1:T + 1, :] + h[2:T + 2, :]                          # (T, w_in)

    # Products are consumed immediately by box2 -> only one (T+2, w_in) product
    # is live at a time (instead of ixx/iyy/ixy all held simultaneously).
    sxx = box2(ix * ix).astype(jnp.float32)
    syy = box2(iy * iy).astype(jnp.float32)
    sxy = box2(ix * iy).astype(jnp.float32)
    det = sxx * syy - sxy * sxy
    tr = sxx + syy
    resp = det - 0.04 * tr * tr
    # TODO(synk): cv2 border handling / 8-bit rescaling not reproduced bit-exactly.
    out_ref[...] = resp[:, 0:w_out]


@functools.lru_cache(maxsize=None)
def _harris_fn(H, W, row_tile, compute_dtype_name):
    """Build (once per shape/config) a jitted gray+pad+pallas_call pipeline."""
    assert H >= 4 and W >= 4 and row_tile % 8 == 0
    cdt = np.dtype(compute_dtype_name)

    # >=2 row tiles whenever possible so the "parallel" grid axis can shard the
    # rows across v7x's two TensorCores; tile size adapts to H to avoid padding
    # waste.  row_tile=256-512 reaches ~85% of HBM roofline on v6e; keep 128-256
    # on v7x (64 MiB VMEM).
    n_tiles = max(_cdiv(H, row_tile), 2 if H >= 16 else 1)
    tile_h = _round_up(_cdiv(H, n_tiles), 8)
    h_pad = n_tiles * tile_h
    w_out = _round_up(W, 128)          # lane-dense output width (unmasked vst)
    w_in = _round_up(W + 4, 128)       # tightest lane-dense input width
    rows_in = h_pad + 8                # + one 8-row halo block below the last tile

    kernel = functools.partial(_harris_kernel, tile_h, w_in, w_out)
    call = pl.pallas_call(
        kernel,
        out_shape=jax.ShapeDtypeStruct((h_pad, w_out), jnp.float32),
        grid=(n_tiles,),
        in_specs=[
            # main rows of the tile: padded rows [i*tile_h, (i+1)*tile_h)
            pl.BlockSpec((tile_h, w_in), lambda i: (i, 0)),
            # 8-row halo below the tile: padded rows [(i+1)*tile_h, (i+1)*tile_h+8)
            pl.BlockSpec((8, w_in), lambda i: ((i + 1) * (tile_h // 8), 0)),
        ],
        out_specs=pl.BlockSpec((tile_h, w_out), lambda i: (i, 0)),
        compiler_params=pltpu.CompilerParams(
            dimension_semantics=("parallel",),
            # above v5e's 16 MiB / v6e's 32 MiB defaults, below v7x's 64 MiB.
            vmem_limit_bytes=56 * 1024 * 1024),
    )

    def fn(frame):
        frame = frame.astype(jnp.float32)
        gray = (0.2989 * frame[0] + 0.587 * frame[1]
                + 0.114 * frame[2]).astype(cdt)                       # (H, W)
        # ONE full-size constant pad + four O(edge) reflect-101 fix-ups (updated
        # in place under jit) instead of v2's two full-frame pad passes.
        gp = jnp.pad(gray, ((2, rows_in - H - 2), (2, w_in - W - 2)))
        gp = gp.at[2:H + 2, 0:2].set(gray[:, 1:3][:, ::-1])           # left halo
        gp = gp.at[2:H + 2, W + 2:W + 4].set(gray[:, W - 3:W - 1][:, ::-1])
        gp = gp.at[0:2, :].set(gp[3:5, :][::-1, :])                   # top halo
        gp = gp.at[H + 2:H + 4, :].set(gp[H - 1:H + 1, :][::-1, :])   # bottom halo
        return call(gp, gp)   # same array feeds the main spec and the halo spec

    return jax.jit(fn)


def harris_response(frame, row_tile=256, compute_dtype=jnp.float32):
    """frame: (3, H, W) float -> PADDED (h_pad, w_out) float32 Harris response.

    Crop to [:H, :W] on the host after device_get (avoids an on-device crop pass
    and ships the map once).  compute_dtype=jnp.bfloat16 is a good choice on
    v6e/v7x; keep float32 on v5e (no bf16 VPU).
    """
    frame = jnp.asarray(frame)
    C, H, W = frame.shape
    assert C == 3
    return _harris_fn(int(H), int(W), int(row_tile),
                      np.dtype(compute_dtype).name)(frame)


# ----------------------------------------------------------------------------
# Kernels 2+3: pairwise match (cdist+argmin) and visibility reduction
# ----------------------------------------------------------------------------
_BIG = 1.0e6   # coordinate used to pad query rows: squared distance ~2e12 never wins


def _pad2d(x, rows, cols, value=0.0):
    x = jnp.asarray(x, jnp.float32)
    r, c = x.shape
    return jnp.pad(x, ((0, rows - r), (0, cols - c)), constant_values=value)


def _cdist_argmin_body(na_pad, av, btv):
    """Column-wise min/argmin of pairwise L2 distance, reduced in squared space.

    av: (Na_pad, 2), btv: (2, Nb_pad).  The (Na_pad, Nb_pad) squared-distance
    matrix lives only in VMEM/vregs; only the (1, Nb_pad) results are stored.
    """
    dx = av[:, 0:1] - btv[0:1, :]
    dy = av[:, 1:2] - btv[1:2, :]
    d2 = dx * dx + dy * dy                                 # (Na_pad, Nb_pad)
    m2 = jnp.min(d2, axis=0, keepdims=True)                # (1, Nb_pad)
    ids = jax.lax.broadcasted_iota(jnp.int32, d2.shape, 0)
    cand = jnp.where(d2 <= m2, ids, jnp.int32(na_pad))     # first index achieving min
    amin = jnp.min(cand, axis=0, keepdims=True)
    # TODO(synk): min+argmin could be fused into one reduction pass; at current
    # track counts the kernel is launch-overhead dominated, so keep it simple.
    return amin, jnp.sqrt(m2)                              # sqrt only on (1, Nb_pad)


def _vis_body(v):
    m = jnp.max(v, axis=0, keepdims=True)                  # (1, N_pad)
    return m, jnp.sum(m, keepdims=True)                    # (1, 1)


@functools.lru_cache(maxsize=None)
def _cdist_argmin_call(na_pad, nb_pad):
    def kernel(a_ref, bt_ref, amin_ref, mval_ref):
        amin, mval = _cdist_argmin_body(na_pad, a_ref[...], bt_ref[...])
        amin_ref[...] = amin
        mval_ref[...] = mval
    return jax.jit(pl.pallas_call(
        kernel,
        out_shape=(jax.ShapeDtypeStruct((1, nb_pad), jnp.int32),
                   jax.ShapeDtypeStruct((1, nb_pad), jnp.float32)),
        in_specs=[pl.BlockSpec(memory_space=pltpu.MemorySpace.VMEM)] * 2,
        out_specs=(pl.BlockSpec(memory_space=pltpu.MemorySpace.VMEM),) * 2,
    ))


def cdist_argmin(a, b):
    """a: (Na, 2), b: (Nb, 2) -> (argmin (Nb,) int32, min L2 dist (Nb,) float32)."""
    na, nb = int(a.shape[0]), int(b.shape[0])
    na_pad = _pow2_bucket(na, 8)        # fixed buckets -> few recompiles
    nb_pad = _pow2_bucket(nb, 128)
    a_p = _pad2d(a, na_pad, 2, value=_BIG)
    bt_p = _pad2d(jnp.asarray(b, jnp.float32).T, 2, nb_pad)
    amin, mval = _cdist_argmin_call(na_pad, nb_pad)(a_p, bt_p)
    return amin[0, :nb], mval[0, :nb]


@functools.lru_cache(maxsize=None)
def _vis_reduce_call(l_pad, n_pad):
    def kernel(v_ref, max_ref, sum_ref):
        m, s = _vis_body(v_ref[...])
        max_ref[...] = m
        sum_ref[...] = s
    return jax.jit(pl.pallas_call(
        kernel,
        out_shape=(jax.ShapeDtypeStruct((1, n_pad), jnp.float32),
                   jax.ShapeDtypeStruct((1, 1), jnp.float32)),
        in_specs=[pl.BlockSpec(memory_space=pltpu.MemorySpace.VMEM)],
        out_specs=(pl.BlockSpec(memory_space=pltpu.MemorySpace.VMEM),) * 2,
    ))


def vis_reduce(vis_window):
    """vis_window: (L, N) >=0 -> (max over frames (N,), sum of maxima scalar)."""
    L, n = vis_window.shape
    l_pad = _round_up(max(L, 8), 8)
    n_pad = _pow2_bucket(n, 128)
    v = _pad2d(vis_window, l_pad, n_pad)
    m, s = _vis_reduce_call(l_pad, n_pad)(v)
    return m[0, :n], s[0, 0]


@functools.lru_cache(maxsize=None)
def _fused_track_reduce_call(l_pad, n_pad, na_pad, nb_pad):
    def kernel(v_ref, a_ref, bt_ref, max_ref, sum_ref, amin_ref, mval_ref):
        m, s = _vis_body(v_ref[...])
        max_ref[...] = m
        sum_ref[...] = s
        amin, mval = _cdist_argmin_body(na_pad, a_ref[...], bt_ref[...])
        amin_ref[...] = amin
        mval_ref[...] = mval
    return jax.jit(pl.pallas_call(
        kernel,
        out_shape=(jax.ShapeDtypeStruct((1, n_pad), jnp.float32),
                   jax.ShapeDtypeStruct((1, 1), jnp.float32),
                   jax.ShapeDtypeStruct((1, nb_pad), jnp.int32),
                   jax.ShapeDtypeStruct((1, nb_pad), jnp.float32)),
        in_specs=[pl.BlockSpec(memory_space=pltpu.MemorySpace.VMEM)] * 3,
        out_specs=(pl.BlockSpec(memory_space=pltpu.MemorySpace.VMEM),) * 4,
    ))


def fused_track_reduce(vis_window, acc_end, new_start):
    """One pallas_call for the tracking path: visibility max/sum over the lost
    window AND nearest-neighbour matching of accumulated-track ends to new
    track starts.  Returns host numpy values via a single device_get."""
    L, n = vis_window.shape
    na, nb = int(acc_end.shape[0]), int(new_start.shape[0])
    l_pad = _round_up(max(L, 8), 8)
    n_pad = _pow2_bucket(n, 128)
    na_pad = _pow2_bucket(na, 8)
    nb_pad = _pow2_bucket(nb, 128)
    v = _pad2d(vis_window, l_pad, n_pad)
    a = _pad2d(acc_end, na_pad, 2, value=_BIG)
    bt = _pad2d(jnp.asarray(new_start, jnp.float32).T, 2, nb_pad)
    outs = _fused_track_reduce_call(l_pad, n_pad, na_pad, nb_pad)(v, a, bt)
    max_v, sum_v, amin, mval = jax.device_get(outs)    # single host sync
    return (np.asarray(max_v)[0, :n], float(np.asarray(sum_v)[0, 0]),
            np.asarray(amin)[0, :nb], np.asarray(mval)[0, :nb])


# ----------------------------------------------------------------------------
# PointTracker (host-side orchestration, Pallas kernels on the hot paths)
# ----------------------------------------------------------------------------
class PointTrackerPallas:
    def __init__(self, height, width, sim_tracks=16,
                 nbr_grid_cell_width=4, nbr_grid_cell_height=4,
                 harris_row_tile=256, harris_dtype=jnp.float32):
        self.H, self.W = height, width
        self.cnt = 0
        self.OnlineCoTracker_initialized = False
        self.accumulated_tracks = None
        self.sim_tracks = sim_tracks
        self.ncw = nbr_grid_cell_width
        self.nch = nbr_grid_cell_height
        self.harris_row_tile = harris_row_tile
        self.harris_dtype = harris_dtype
        # TODO(synk): CoTracker2Online and OpticalFlow are external pretrained
        # networks (configs/weights not defined by this module); they are
        # replaced by a deterministic surrogate tracker below.
        self._drift = np.asarray(
            jax.random.normal(jax.random.PRNGKey(0), (2,), dtype=jnp.float32)) * 0.5
        self._tracked_queries = None

    # ---- surrogate for CoTracker2Online.forward(video, points, is_first_step=False)
    def _surrogate_cotracker(self, T):
        q = self._tracked_queries                     # (N, 2) float32
        n = q.shape[0]
        t = np.arange(T, dtype=np.float32)[:, None, None]
        traj = (q[None, :, :] + t * self._drift[None, None, :])[None]  # (1,T,N,2)
        if self.cnt % 2 == 0:     # deterministically trigger the re-init branch
            vis = np.zeros((1, T, n), np.float32)
            vis[0, :, :min(4, n)] = 1.0
        else:
            vis = np.ones((1, T, n), np.float32)
        return traj.astype(np.float32), vis

    # ---- init_harris (keypoint sampling; Harris response via Pallas kernel)
    def init_harris(self, data, num_tracks_max=None, sim_tracks=None,
                    init_queries_first_frame=None, **kwargs):
        if sim_tracks is None:
            sim_tracks = self.sim_tracks
        if init_queries_first_frame is None:
            init_queries_first_frame = np.empty((0, 2), np.float32)
        video_chunck = data['video_chunk']             # (B, T, 3, H, W)
        B, T, _, H, W = video_chunck.shape
        assert T >= 1
        src_step = 0
        src_frame = video_chunck[:, src_step]          # (B, 3, H, W)

        nbr_per_cell = sim_tracks // (self.ncw * self.nch)
        difference = sim_tracks % (self.ncw * self.nch)
        cell_width = src_frame.shape[2] // self.ncw
        cell_height = src_frame.shape[3] // self.nch
        nbr_new = np.full((self.ncw, self.nch), nbr_per_cell)
        for i in range(init_queries_first_frame.shape[0]):
            cw = int(min(self.ncw - 1,
                         max(0, float(init_queries_first_frame[i][0])) // cell_width))
            ch = int(min(self.nch - 1,
                         max(0, float(init_queries_first_frame[i][1])) // cell_height))
            nbr_new[cw, ch] -= 1

        # Pallas kernel (returns the lane-dense padded map); crop on the host.
        # TODO(synk): per-cell top-k could run on device to shrink D2H further.
        harris_pad = np.asarray(jax.device_get(harris_response(
            src_frame[0], row_tile=self.harris_row_tile,
            compute_dtype=self.harris_dtype)))
        harris_dist = harris_pad[:src_frame.shape[2], :src_frame.shape[3]]

        queries = np.asarray(init_queries_first_frame, np.float32).reshape(-1, 2)
        for cw in range(self.ncw):
            for ch in range(self.nch):
                local = harris_dist[cw * cell_width:(cw + 1) * cell_width,
                                    ch * cell_height:(ch + 1) * cell_height]
                n_k = max(0, int(nbr_new[cw, ch]))
                if difference > 0:
                    difference -= 1
                    n_k += 1
                if n_k <= 0:
                    continue
                flat_idx = np.argpartition(local.flatten(), -n_k)[-n_k:]
                rr, cc = np.unravel_index(flat_idx, local.shape)
                corners = np.stack([rr + cw * cell_width,
                                    cc + ch * cell_height], axis=1).astype(np.float32)
                queries = np.concatenate([queries, corners], axis=0)

        src_steps = np.full((queries.shape[0], 1), src_step, np.float32)
        src_corners = np.concatenate([src_steps, queries], axis=1)[None]  # (1, N, 3)
        _ = src_corners  # would be handed to CoTracker2Online(is_first_step=True)
        self._tracked_queries = queries.astype(np.float32)
        self.OnlineCoTracker_initialized = True

    # ---- merge_accumulated_tracks (matching on TPU, dynamic growth on host)
    def merge_accumulated_tracks(self, tracks, track_overlap=4, matching_threshold=15,
                                 amin=None, mval=None):
        if self.accumulated_tracks is None:
            return tracks
        increase = tracks.shape[1] - track_overlap
        out_tracks = np.pad(self.accumulated_tracks,
                            ((0, 0), (0, increase), (0, 0), (0, 0)))
        start_of_new_track = tracks.shape[1]
        if amin is None or mval is None:
            acc_end = self.accumulated_tracks[0, -track_overlap, :, :2]
            new_start = tracks[0, 0, :, :2]
            amin, mval = jax.device_get(cdist_argmin(acc_end, new_start))  # Pallas kernel
        for tr in range(tracks.shape[2]):
            if mval[tr] < matching_threshold:
                out_tracks[:, -start_of_new_track:, int(amin[tr]), :] = tracks[:, :, tr, :]
            else:
                out_tracks = np.pad(out_tracks, ((0, 0), (0, 0), (0, 1), (0, 0)))
                out_tracks[:, -start_of_new_track:, -1, :] = tracks[:, :, tr, :]
        return out_tracks

    # ---- get_tracks_online_droid
    def get_tracks_online_droid(self, data, num_tracks=None, sim_tracks=None, **kwargs):
        if sim_tracks is None:
            sim_tracks = self.sim_tracks
        S = sim_tracks
        video_chunck = data['video_chunk']
        B, T, _, H, W = video_chunck.shape
        tracks = []
        if not self.OnlineCoTracker_initialized:
            self.accumulated_tracks = None
            self.init_harris(data, num_tracks_max=num_tracks, sim_tracks=sim_tracks)
            return {'tracks': tracks}

        lost_nbr_of_frame_not_visible = 5
        threshold_minimum_nbr_visible_tracks_wanted = 7 * S // 8
        track_overlap = 4
        traj, vis = self._surrogate_cotracker(T)
        tracks.append(np.concatenate([traj, vis[..., None]], axis=-1))
        tracks = np.concatenate(tracks, axis=2)

        vis_window = vis[0, -lost_nbr_of_frame_not_visible:, :]
        if self.accumulated_tracks is not None:
            # fused Pallas kernel: visibility reduction + accumulated<->new matching,
            # fetched with a single device->host sync.
            acc_end = self.accumulated_tracks[0, -track_overlap, :, :2]
            new_start = tracks[0, 0, :, :2]
            tracks_not_lost_vis, sum_vis, amin, mval = fused_track_reduce(
                vis_window, acc_end, new_start)
            tracks = self.merge_accumulated_tracks(
                tracks, track_overlap=track_overlap, amin=amin, mval=mval)
        else:
            max_v, sum_v = jax.device_get(vis_reduce(vis_window))      # Pallas kernel
            tracks_not_lost_vis, sum_vis = max_v, float(sum_v)
            tracks = self.merge_accumulated_tracks(tracks, track_overlap=track_overlap)

        if sum_vis < threshold_minimum_nbr_visible_tracks_wanted:
            self.accumulated_tracks = tracks
            mask = tracks_not_lost_vis == 1
            queries_kept = traj[0, -1, mask, :]
            self.init_harris(data, num_tracks_max=num_tracks, sim_tracks=sim_tracks,
                             init_queries_first_frame=queries_kept)
        return {'tracks': tracks}

    def forward(self, data, mode, **kwargs):
        self.cnt += 1
        if mode == 'tracks_online_droid':
            return self.get_tracks_online_droid(data, **kwargs)
        raise ValueError(f'Unknown mode {mode}')


# ----------------------------------------------------------------------------
if __name__ == "__main__":
    key = jax.random.PRNGKey(0)
    B, T, C, H, W = 1, 8, 3, 32, 32
    video = jax.random.uniform(key, (B, T, C, H, W), dtype=jnp.float32)
    data = {'video_chunk': video}

    # small row tile so the demo actually exercises the multi-step "parallel"
    # grid and the main+halo BlockSpec streaming
    tracker = PointTrackerPallas(H, W, sim_tracks=16,
                                 nbr_grid_cell_width=4, nbr_grid_cell_height=4,
                                 harris_row_tile=8, harris_dtype=jnp.float32)

    # call 1: initialization path (row-tiled Harris kernel)
    out1 = tracker.forward(data, 'tracks_online_droid')
    # call 2: tracking path, triggers visibility-based re-init (vis kernel)
    out2 = tracker.forward(data, 'tracks_online_droid')
    # call 3: tracking path with non-empty accumulated tracks (fused vis+cdist kernel)
    out3 = tracker.forward(data, 'tracks_online_droid')

    final = jax.block_until_ready(jnp.asarray(out3['tracks'], jnp.float32))
    assert final.ndim == 4 and final.shape[0] == 1 and final.shape[-1] == 3
    print("KERNEL_OK")
</pallas_src>

<mosaic_0001>
module attributes {stable_mosaic.version = 11 : i64} {
  func.func @_harris_kernel(%arg0: i32, %arg1: memref<8x128xf32, #tpu.memory_space<vmem>>, %arg2: memref<8x128xf32, #tpu.memory_space<vmem>>, %arg3: memref<8x128xf32, #tpu.memory_space<vmem>>) attributes {dimension_semantics = [#tpu.dimension_semantics<parallel>], iteration_bounds = array<i64: 4>, scalar_prefetch = 0 : i64, scratch_operands = 0 : i64, tpu.core_type = #tpu.core_type<tc>, window_params = [{transform_indices = @transform_0, window_bounds = array<i64: 8, 128>}, {transform_indices = @transform_1, window_bounds = array<i64: 8, 128>}, {transform_indices = @transform_2, window_bounds = array<i64: 8, 128>}]} {
    %c0 = arith.constant 0 : index
    %c0_0 = arith.constant 0 : index
    %0 = vector.load %arg1[%c0, %c0_0] : memref<8x128xf32, #tpu.memory_space<vmem>>, vector<8x128xf32>
    %c0_1 = arith.constant 0 : index
    %c0_2 = arith.constant 0 : index
    %1 = vector.load %arg2[%c0_1, %c0_2] : memref<8x128xf32, #tpu.memory_space<vmem>>, vector<4x128xf32>
    %2 = tpu.concatenate %0, %1 in 0 : vector<8x128xf32>, vector<4x128xf32> -> vector<12x128xf32>
    %3 = vector.extract_strided_slice %2 {offsets = [0, 0], sizes = [10, 128], strides = [1, 1]} : vector<12x128xf32> to vector<10x128xf32>
    %4 = vector.extract_strided_slice %2 {offsets = [1, 0], sizes = [10, 128], strides = [1, 1]} : vector<12x128xf32> to vector<10x128xf32>
    %cst = arith.constant 2.000000e+00 : f32
    %5 = vector.broadcast %cst : f32 to vector<10x128xf32>
    %6 = arith.mulf %5, %4 : vector<10x128xf32>
    %7 = arith.addf %3, %6 : vector<10x128xf32>
    %8 = vector.extract_strided_slice %2 {offsets = [2, 0], sizes = [10, 128], strides = [1, 1]} : vector<12x128xf32> to vector<10x128xf32>
    %9 = arith.addf %7, %8 : vector<10x128xf32>
    %c126_i32 = arith.constant 126 : i32
    %10 = tpu.dynamic_rotate %9 by %c126_i32 dim 1 : vector<10x128xf32>, i32 -> vector<10x128xf32>
    %11 = arith.subf %10, %9 : vector<10x128xf32>
    %cst_3 = arith.constant 1.250000e-01 : f32
    %12 = vector.broadcast %cst_3 : f32 to vector<10x128xf32>
    %13 = arith.mulf %11, %12 : vector<10x128xf32>
    %c127_i32 = arith.constant 127 : i32
    %14 = tpu.dynamic_rotate %2 by %c127_i32 dim 1 : vector<12x128xf32>, i32 -> vector<12x128xf32>
    %cst_4 = arith.constant 2.000000e+00 : f32
    %15 = vector.broadcast %cst_4 : f32 to vector<12x128xf32>
    %16 = arith.mulf %15, %14 : vector<12x128xf32>
    %17 = arith.addf %2, %16 : vector<12x128xf32>
    %c126_i32_5 = arith.constant 126 : i32
    %18 = tpu.dynamic_rotate %2 by %c126_i32_5 dim 1 : vector<12x128xf32>, i32 -> vector<12x128xf32>
    %19 = arith.addf %17, %18 : vector<12x128xf32>
    %20 = vector.extract_strided_slice %19 {offsets = [2, 0], sizes = [10, 128], strides = [1, 1]} : vector<12x128xf32> to vector<10x128xf32>
    %21 = vector.extract_strided_slice %19 {offsets = [0, 0], sizes = [10, 128], strides = [1, 1]} : vector<12x128xf32> to vector<10x128xf32>
    %22 = arith.subf %20, %21 : vector<10x128xf32>
    %cst_6 = arith.constant 1.250000e-01 : f32
    %23 = vector.broadcast %cst_6 : f32 to vector<10x128xf32>
    %24 = arith.mulf %22, %23 : vector<10x128xf32>
    %25 = arith.mulf %13, %13 : vector<10x128xf32>
    %c127_i32_7 = arith.constant 127 : i32
    %26 = tpu.dynamic_rotate %25 by %c127_i32_7 dim 1 : vector<10x128xf32>, i32 -> vector<10x128xf32>
    %c126_i32_8 = arith.constant 126 : i32
    %27 = tpu.dynamic_rotate %25 by %c126_i32_8 dim 1 : vector<10x128xf32>, i32 -> vector<10x128xf32>
    %28 = arith.addf %26, %27 : vector<10x128xf32>
    %29 = vector.extract_strided_slice %28 {offsets = [1, 0], sizes = [8, 128], strides = [1, 1]} : vector<10x128xf32> to vector<8x128xf32>
    %30 = vector.extract_strided_slice %28 {offsets = [2, 0], sizes = [8, 128], strides = [1, 1]} : vector<10x128xf32> to vector<8x128xf32>
    %31 = arith.addf %29, %30 : vector<8x128xf32>
    %32 = arith.mulf %24, %24 : vector<10x128xf32>
    %c127_i32_9 = arith.constant 127 : i32
    %33 = tpu.dynamic_rotate %32 by %c127_i32_9 dim 1 : vector<10x128xf32>, i32 -> vector<10x128xf32>
    %c126_i32_10 = arith.constant 126 : i32
    %34 = tpu.dynamic_rotate %32 by %c126_i32_10 dim 1 : vector<10x128xf32>, i32 -> vector<10x128xf32>
    %35 = arith.addf %33, %34 : vector<10x128xf32>
    %36 = vector.extract_strided_slice %35 {offsets = [1, 0], sizes = [8, 128], strides = [1, 1]} : vector<10x128xf32> to vector<8x128xf32>
    %37 = vector.extract_strided_slice %35 {offsets = [2, 0], sizes = [8, 128], strides = [1, 1]} : vector<10x128xf32> to vector<8x128xf32>
    %38 = arith.addf %36, %37 : vector<8x128xf32>
    %39 = arith.mulf %13, %24 : vector<10x128xf32>
    %c127_i32_11 = arith.constant 127 : i32
    %40 = tpu.dynamic_rotate %39 by %c127_i32_11 dim 1 : vector<10x128xf32>, i32 -> vector<10x128xf32>
    %c126_i32_12 = arith.constant 126 : i32
    %41 = tpu.dynamic_rotate %39 by %c126_i32_12 dim 1 : vector<10x128xf32>, i32 -> vector<10x128xf32>
    %42 = arith.addf %40, %41 : vector<10x128xf32>
    %43 = vector.extract_strided_slice %42 {offsets = [1, 0], sizes = [8, 128], strides = [1, 1]} : vector<10x128xf32> to vector<8x128xf32>
    %44 = vector.extract_strided_slice %42 {offsets = [2, 0], sizes = [8, 128], strides = [1, 1]} : vector<10x128xf32> to vector<8x128xf32>
    %45 = arith.addf %43, %44 : vector<8x128xf32>
    %46 = arith.mulf %31, %38 : vector<8x128xf32>
    %47 = arith.mulf %45, %45 : vector<8x128xf32>
    %48 = arith.subf %46, %47 : vector<8x128xf32>
    %49 = arith.addf %31, %38 : vector<8x128xf32>
    %cst_13 = arith.constant 4.000000e-02 : f32
    %50 = vector.broadcast %cst_13 : f32 to vector<8x128xf32>
    %51 = arith.mulf %50, %49 : vector<8x128xf32>
    %52 = arith.mulf %51, %49 : vector<8x128xf32>
    %53 = arith.subf %48, %52 : vector<8x128xf32>
    %c0_14 = arith.constant 0 : index
    %c0_15 = arith.constant 0 : index
    %54 = vector.load %arg3[%c0_14, %c0_15] : memref<8x128xf32, #tpu.memory_space<vmem>>, vector<8x128xf32>
    tpu.vector_store %arg3[%c0_14, %c0_15], %53 {strides = array<i32>} : memref<8x128xf32, #tpu.memory_space<vmem>>, vector<8x128xf32>,
    return
  }
  func.func @transform_0(%arg0: i32) -> (i32, i32) {
    %c0_i32 = arith.constant 0 : i32
    %c0_i32_0 = arith.constant 0 : i32
    return %arg0, %c0_i32 : i32, i32
  }
  func.func @transform_1(%arg0: i32) -> (i32, i32) {
    %c1_i32 = arith.constant 1 : i32
    %0 = arith.addi %arg0, %c1_i32 : i32
    %c1_i32_0 = arith.constant 1 : i32
    %1 = arith.muli %0, %c1_i32_0 : i32
    %c0_i32 = arith.constant 0 : i32
    %c0_i32_1 = arith.constant 0 : i32
    return %1, %c0_i32 : i32, i32
  }
  func.func @transform_2(%arg0: i32) -> (i32, i32) {
    %c0_i32 = arith.constant 0 : i32
    %c0_i32_0 = arith.constant 0 : i32
    return %arg0, %c0_i32 : i32, i32
  }
}

</mosaic_0001>

<bundles_post_ra>
// kernel: fn.1
= control target key start
LH: loop header
LB: loop body
LE: loop exit
PB: predicated region body
PF: predicated region fallthrough
CT: control target
= control target key end

     0   :  { %7 = vsyncpa [#allocation3], 0  ;;  %s662_s0 = inlined_call_operand.vmem [shape: f32[40,128], index: 0, kind: input, shape index: {}, may-alias: {0,1}]   ;;  %s663_s1 = inlined_call_operand.vmem [shape: f32[40,128], index: 1, kind: input, shape index: {}, may-alias: {0,1}]   ;;  %s664_s2 = inlined_call_operand.hbm [shape: f32[32,128], index: 2, kind: output, shape index: {}]  }
   0x1   :  { %9 = vsyncpa [#allocation3 + $0x1], 0  ;;  %s533_s9 = smov 0   ;;  %s535_s10 = smov 0  }
   0x2   :  { %s537_s11 = smov 0   ;;  %s539_s12 = smov 0  }
   0x3 LB: > { %s554_s13 = sadd.s32 4294967295, %s513_s12   ;;  %s399_s14 = sadd.s32 4294967294, %s513_s12   ;;  %s513_s12 = sphi %s539_s12, %s670_s12   ;;  %s509_s11 = sphi %s537_s11, %s669_s11   ;;  %s505_s10 = sphi %s535_s10, %s668_s10   ;;  %s501_s9 = sphi %s533_s9, %s667_s9  }
   0x4   : > { %s558_s15 = sadd.s32 1, %s513_s12   ;;  %s76_s16 = sadd.s32 1, %s509_s11 }
   0x5   : > { %s73_s17 = ssub.s32 %s513_s12, %s558_s15  ;;  %p86_p0 = scmp.ne.s32.totalorder %s509_s11, %s505_s10 }
   0x6   : > { %p74_p1 = scmp.eq.s32.totalorder %s73_s17, 0  ;;  %p87_p2 = scmp.eq.s32.totalorder %s554_s13, 3 }
   0x7   : > { %p92_p3 = scmp.ne.s32.totalorder %s505_s10, %s501_s9  ;;  %p93_p4 = scmp.eq.s32.totalorder %s399_s14, 3 }
   0x8   : > { %s569_s18 = scalar_select %p74_p1, %s509_s11, %s76_s16  }
   0x9   : > { %p571_p5 = por %p87_p2, %p86_p0  ;;  %p575_p6 = por %p93_p4, %p92_p3 }
   0xa   : > { %p402_p7 = scmp.ge.s32.totalorder %s513_s12, 1  ;;  %p127_p8 = scmp.lt.s32.totalorder %s513_s12, 5 }
   0xc   : > { %p128_p9 = pnand %p402_p7, %p127_p8 }
   0xd   : > { %p153_p10 = scmp.lt.s32.totalorder (!%p128_p9), %s554_s13, 4  ;;  %s157_s21 = sadd.s32 (!%p128_p9), 1, %s554_s13  ;;  %vm169_vm0 = vcmask (!%p128_p9), 1046528   ;;  %vm179_vm1 = vcmask (!%p128_p9), 1045504   ;;  %vm211_vm2 = vcmask (!%p128_p9), 1041408  }
   0xe   : > { %131 = sbr.rel (%p128_p9) target bundleno = 319 (0x13f), region = 28  ;;  %p158_p11 = scmp.lt.s32.totalorder (!%p128_p9), %s157_s21, 4 }
   0xf   : > { %s515_s27 = smov (!%p128_p9), 127   ;;  %s516_s28 = smov (!%p128_p9), 126  }
  0x10   : > { %s150_s5 = sand.u32 (!%p128_p9), 1, %s505_s10   ;;  %s407_s7 = sshll.u32 (!%p128_p9), %s554_s13, 7 }
  0x11   : > { %s403_s6 = sshll.u32 (!%p128_p9), %s150_s5, 3 }
  0x12   : > { %s152_s8 = scalar_lea.vmem (!%p128_p9), [#allocation2], %s403_s6 }
  0x13   : > { %s328_s14 = sshll.u32 (!%p128_p9), %s152_s8, 4  ;;  %s622_s14 = int_to_ptr.vmem [resolvable:$true] %s328_s14 }
  0x15   : > { %s154_s22 = scalar_select %p153_p10, %s554_s13, 4 }
  0x16   : > { %s672_s21 = smov (!%p158_p11, %s157_s21), 4  ;;  %s451_s13 = scalar_lea.vmem %s622_s14, 128 }
  0x17   : > { %s404_s23 = sshll.u32 %s154_s22, 3  ;;  %s405_s29 = sshll.u32 %s672_s21, 3 }
  0x18   : > { %s156_s26 = scalar_lea.vmem %s662_s0, %s404_s23  ;;  %s161_s4 = scalar_lea.vmem %s663_s1, %s405_s29 }
  0x19   : > { %v163_v0 = vld [vmem:[%s156_s26] sm:$0xff]  ;;  %s620_s21 = scalar_lea.hbm %s664_s2, %s407_s7  ;;  %s315_s22 = scalar_lea.sflag [#allocation3], %s150_s5 }
  0x1a   : > { %195 = vrot.lane.b32.xlu0 %v163_v0, %s515_s27  ;;  %203 = vrot.lane.b32.xlu1 %v163_v0, %s516_s28  ;;  %v165_v1 = vmul.f32 2.0, %v163_v0  ;;  %v164_v2 = vld [vmem:[%s161_s4] sm:$0xf]  ;;  %v180_v6 = vrot.slane %v163_v0, 2  ;;  %p452_p12 = scmp.ne.s32.totalorder %s622_s14, %s451_s13  ;;  %s517_s23 = smov [#allocation2]  }
  0x1b   : > { %v166_v3 = vmul.f32 2.0, %v164_v2  ;;  %v181_v4 = vrot.slane %v164_v2, 2  ;;  %s455_s24 = sshll.u32 %s517_s23, 4  ;;  %s456_s24 = int_to_ptr.vmem [resolvable:$false] %s455_s24 }
  0x1c   : > { %v170_v5 = vrot.slane %v165_v1, 1  ;;  %p453_p13 = pnand %p452_p12, %p571_p5  ;;  %s457_s25 = scalar_lea.vmem %s456_s24, 256 }
  0x1d   : > { %v171_v7 = vrot.slane %v166_v3, 1  ;;  %v182_v10 = vsel %vm179_vm1, %v180_v6, %v181_v4  ;;  %p458_p1 = scmp.lt.s32.totalorder %s622_s14, %s456_s24  ;;  %p459_p2 = scmp.lt.s32.totalorder %s457_s25, %s451_s13 }
  0x1e   : > { %197 = vrot.lane.b32.xlu0 %v164_v2, %s515_s27  ;;  %205 = vrot.lane.b32.xlu1 %v164_v2, %s516_s28  ;;  %p454_p0 = pneg %p453_p13 }
  0x1f   : > { %v176_v8 = vadd.f32 %v171_v7, %v164_v2  ;;  %v172_v9 = vsel %vm169_vm0, %v170_v5, %v171_v7  ;;  %p460_p3 = por %p459_p2, %p458_p1 }
  0x20   : > { %v175_v11 = vadd.f32 %v172_v9, %v163_v0 }
  0x21   : > { %v186_v12 = vadd.f32 %v181_v4, %v176_v8  ;;  %p461_p4 = pnand %p460_p3, %p454_p0 }
  0x22   : > { %v185_v13 = vadd.f32 %v182_v10, %v175_v11 }
  0x23   : > { %189 = vrot.lane.b32.xlu1 %v186_v12, %s516_s28 }
  0x24   : > { %187 = vrot.lane.b32.xlu0 %v185_v13, %s516_s28 }
  0x8c   : > { %v196_v14 = vpop.permute.xlu0 %195  ;;  %v204_v15 = vpop.permute.xlu1 %203 }
  0x8d   : > { %v199_v16 = vmul.f32 2.0, %v196_v14 }
  0x8f   : > { %v201_v17 = vadd.f32 %v199_v16, %v163_v0 }
  0x90   : > { %v198_v18 = vpop.permute.xlu0 %197  ;;  %v206_v21 = vpop.permute.xlu1 %205 }
  0x91   : > { %v207_v19 = vadd.f32 %v204_v15, %v201_v17  ;;  %v200_v20 = vmul.f32 2.0, %v198_v18 }
  0x93   : > { %v202_v22 = vadd.f32 %v200_v20, %v164_v2  ;;  %v212_v23 = vrot.slane %v207_v19, 6 }
  0x95   : > { %v208_v24 = vadd.f32 %v206_v21, %v202_v22  ;;  %v190_v26 = vpop.permute.xlu1 %189  ;;  %v217_v27 = vsub.f32 %v207_v19, %v212_v23 }
  0x96   : > { %v192_v29 = vsub.f32 %v190_v26, %v186_v12  ;;  %v188_v30 = vpop.permute.xlu0 %187 }
  0x97   : > { %v213_v25 = vrot.slane %v208_v24, 6  ;;  %v191_v32 = vsub.f32 %v188_v30, %v185_v13  ;;  %v219_v36 = vmul.f32 0.125, %v217_v27 }
  0x98   : > { %v194_v33 = vmul.f32 0.125, %v192_v29 }
  0x99   : > { %v214_v28 = vsel %vm211_vm2, %v212_v23, %v213_v25  ;;  %v193_v35 = vmul.f32 0.125, %v191_v32  ;;  %v242_v40 = vmul.f32 %v219_v36, %v219_v36  ;;  %v272_v45 = vrot.slane %v219_v36, 2 }
  0x9a   : > { %v218_v31 = vsub.f32 %v208_v24, %v214_v28  ;;  %v222_v37 = vmul.f32 %v194_v33, %v194_v33 }
  0x9b   : > { %v221_v38 = vmul.f32 %v193_v35, %v193_v35  ;;  %v246_v42 = vrot.slane %v242_v40, 2 }
  0x9c   : > { %v220_v34 = vmul.f32 0.125, %v218_v31  ;;  %225 = vrot.lane.b32.xlu1 %v222_v37, %s515_s27 }
  0x9d   : > { %223 = vrot.lane.b32.xlu0 %v221_v38, %s515_s27 }
  0x9e   : > { %v243_v39 = vmul.f32 %v220_v34, %v220_v34  ;;  %v273_v43 = vrot.slane %v220_v34, 2 }
  0xa0   : > { %229 = vrot.lane.b32.xlu1 %v222_v37, %s516_s28  ;;  %v247_v41 = vrot.slane %v243_v39, 2  ;;  %v274_v46 = vsel %vm179_vm1, %v272_v45, %v273_v43  ;;  %v278_v47 = vmul.f32 %v273_v43, %v194_v33 }
  0xa1   : > { %227 = vrot.lane.b32.xlu0 %v221_v38, %s516_s28  ;;  %v277_v48 = vmul.f32 %v274_v46, %v193_v35 }
  0xa2   : > { %v248_v44 = vsel %vm179_vm1, %v246_v42, %v247_v41 }
  0xa4   : > { %253 = vrot.lane.b32.xlu1 %v247_v41, %s515_s27 }
  0xa5   : > { %251 = vrot.lane.b32.xlu0 %v248_v44, %s515_s27 }
  0xa8   : > { %257 = vrot.lane.b32.xlu1 %v247_v41, %s516_s28 }
  0xa9   : > { %255 = vrot.lane.b32.xlu0 %v248_v44, %s516_s28 }
  0xac   : > { %281 = vrot.lane.b32.xlu1 %v278_v47, %s515_s27 }
  0xad   : > { %279 = vrot.lane.b32.xlu0 %v277_v48, %s515_s27 }
  0xb0   : > { %285 = vrot.lane.b32.xlu1 %v278_v47, %s516_s28 }
  0xb1   : > { %283 = vrot.lane.b32.xlu0 %v277_v48, %s516_s28 }
 0x10e   : > { %v226_v49 = vpop.permute.xlu1 %225 }
 0x10f   : > { %v224_v50 = vpop.permute.xlu0 %223 }
 0x112   : > { %v230_v51 = vpop.permute.xlu1 %229 }
 0x113   : > { %v228_v52 = vpop.permute.xlu0 %227  ;;  %v232_v55 = vadd.f32 %v230_v51, %v226_v49 }
 0x114   : > { %v231_v56 = vadd.f32 %v228_v52, %v224_v50 }
 0x115   : > { %v236_v60 = vrot.slane %v232_v55, 1 }
 0x116   : > { %v254_v53 = vpop.permute.xlu1 %253  ;;  %v235_v61 = vrot.slane %v231_v56, 1 }
 0x117   : > { %v252_v54 = vpop.permute.xlu0 %251  ;;  %v241_v6 = vadd.f32 %v236_v60, %v232_v55 }
 0x118   : > { %v237_v4 = vsel %vm169_vm0, %v235_v61, %v236_v60 }
 0x119   : > { %v240_v9 = vadd.f32 %v237_v4, %v231_v56 }
 0x11a   : > { %v258_v57 = vpop.permute.xlu1 %257 }
 0x11b   : > { %v260_v58 = vadd.f32 %v258_v57, %v254_v53  ;;  %v256_v59 = vpop.permute.xlu0 %255 }
 0x11c   : > { %v259_v62 = vadd.f32 %v256_v59, %v252_v54 }
 0x11d   : > { %v264_v63 = vrot.slane %v260_v58, 1 }
 0x11e   : > { %v263_v0 = vrot.slane %v259_v62, 1  ;;  %v282_v1 = vpop.permute.xlu1 %281 }
 0x11f   : > { %v269_v2 = vadd.f32 %v264_v63, %v260_v58  ;;  %v280_v3 = vpop.permute.xlu0 %279 }
 0x120   : > { %v265_v5 = vsel %vm169_vm0, %v263_v0, %v264_v63 }
 0x121   : > { %v268_v7 = vadd.f32 %v265_v5, %v259_v62  ;;  %v305_v10 = vadd.f32 %v269_v2, %v241_v6  ;;  %v299_v20 = vmul.f32 %v269_v2, %v241_v6 }
 0x122   : > { %v286_v8 = vpop.permute.xlu1 %285 }
 0x123   : > { %v288_v11 = vadd.f32 %v286_v8, %v282_v1  ;;  %v284_v12 = vpop.permute.xlu0 %283  ;;  %v304_v14 = vadd.f32 %v268_v7, %v240_v9  ;;  %v307_v17 = vmul.f32 0.04, %v305_v10  ;;  %v298_v25 = vmul.f32 %v268_v7, %v240_v9 }
 0x124   : > { %v287_v13 = vadd.f32 %v284_v12, %v280_v3 }
 0x125   : > { %v292_v15 = vrot.slane %v288_v11, 1  ;;  %v306_v21 = vmul.f32 0.04, %v304_v14  ;;  %v309_v24 = vmul.f32 %v307_v17, %v305_v10 }
 0x126   : > { %v291_v16 = vrot.slane %v287_v13, 1 }
 0x127   : > { %v297_v18 = vadd.f32 %v292_v15, %v288_v11  ;;  %v308_v28 = vmul.f32 %v306_v21, %v304_v14 }
 0x128   : > { %v293_v19 = vsel %vm169_vm0, %v291_v16, %v292_v15 }
 0x129   : > { %v301_v22 = vmul.f32 %v297_v18, %v297_v18  ;;  %v296_v23 = vadd.f32 %v293_v19, %v287_v13 }
 0x12b   : > { %v303_v26 = vsub.f32 %v299_v20, %v301_v22  ;;  %v300_v27 = vmul.f32 %v296_v23, %v296_v23 }
 0x12d   : > { %v311_v29 = vsub.f32 %v303_v26, %v309_v24  ;;  %v302_v30 = vsub.f32 %v298_v25, %v300_v27 }
 0x12f   : > { %v310_v31 = vsub.f32 %v302_v30, %v308_v28  ;;  %313 = vst [vmem:[%s152_s8 + $0x7] sm:$0x1] %v311_v29 }
 0x131   : > { %312 = vst [vmem:[%s152_s8 - $0x1] sm:$0xfe] %v310_v31 }
 0x132   : > { %464 = shalt.err (!%p461_p4)
}
 0x133   : > { %s465_s26 = scalar_lea.hbm %s620_s21, 128  ;;  %s469_s29 = scalar_lea.hbm %s664_s2, 512 }
 0x134   : > { %p466_p7 = scmp.ne.s32.totalorder %s620_s21, %s465_s26  ;;  %p470_p10 = scmp.lt.u32.totalorder %s620_s21, %s664_s2 }
 0x135   : > { %p471_p11 = scmp.lt.u32.totalorder %s469_s29, %s465_s26  ;;  %p473_p13 = scmp.lt.u32.totalorder %s465_s26, %s620_s21 }
 0x136   : > { %p467_p8 = pnand %p466_p7, %p571_p5 }
 0x137   : > { %p472_p12 = por %p471_p11, %p470_p10 }
 0x138   : > { %p468_p9 = pneg %p467_p8 }
 0x139   : > { %p474_p0 = por %p473_p13, %p472_p12 }
 0x13b   : > { %p475_p1 = pnand %p474_p0, %p468_p9 }
 0x13d   : > { %478 = shalt.err (!%p475_p1)
}
 0x13e   : > { %410 = dma.vmem_to_hbm [thread:$0]  (%p571_p5), %s622_s14, 128, %s620_s21, %s315_s22  }
 0x13f PF: > { %p416_p2 = scmp.ge.s32.totalorder %s513_s12, 2  ;;  %s340_s4 = sand.u32 1, %s501_s9  }
 0x140   : > { %s341_s5 = scalar_lea.sflag [#allocation3], %s340_s4 }
 0x141   : > { %p413_p3 = pnand %p416_p2, %p575_p6 }
 0x143   : > { %496 = dma.done.wait (!%p413_p3), %s341_s5, 128  }
 0x144   : > { %498 = vsyncadd (!%p413_p3), %s341_s5, 4294967168  ;;  %p12_p4 = scmp.ge.s32.totalorder %s558_s15, 6   ;;  %s667_s9 = smov %s505_s10 }
 0x145   : > { %s668_s10 = smov %s509_s11  ;;  %s669_s11 = smov %s569_s18 }
 0x146   : > { %s670_s12 = smov %s558_s15  ;;  %14 = sbr.rel (!%p12_p4) target bundleno = 3 (0x3), region = 66 }
 0x14d   :  { %346 = vsyncpa [#allocation3], 1 }
 0x14e   :  { %348 = vsyncpa [#allocation3 + $0x1], 1 }

</bundles_post_ra>
